<compile_context>
chip_gen: v7x
topology: tpu7x:2x2x1
jax: 0.10.0
libtpu: 0.0.40
codegen_flags: <defaults>
</compile_context>

<pallas_src>
import jax
import jax.numpy as jnp
from jax.experimental import pallas as pl
from jax.experimental.pallas import tpu as pltpu  # noqa: F401  (TPU backend import)


# ---------------------------------------------------------------------------
# Pallas kernel (coupled branch): single (n_ctx, 512) @ (512, 768) matmul
# ---------------------------------------------------------------------------

def _proj_kernel(ctx_ref, proj_ref, out_ref):
    """out = ctx @ proj, accumulated in f32 on the MXU.

    ctx_ref  : (n_ctx, 512)  VMEM  (any float dtype; cast to weight dtype here,
                                    VPU cast on 16 KiB is free)
    proj_ref : (512, 768)    VMEM  (fp32 or bf16 — whatever the params store)
    out_ref  : (n_ctx, 768)  VMEM  (lane dim 768 is a clean multiple of 128)
    """
    ctx = ctx_ref[...].astype(proj_ref.dtype)
    out_ref[...] = jnp.dot(
        ctx, proj_ref[...], preferred_element_type=jnp.float32
    ).astype(out_ref.dtype)


# ---------------------------------------------------------------------------
# Param-load-time projection (runs ONCE, not per forward call)
# ---------------------------------------------------------------------------

def project_text_prompt(text_embeddings, prompt_proj, out_dtype=jnp.float32):
    """Compute text_embeddings @ prompt_proj once (x-independent).

    Call this at parameter-load / optimizer-step-setup time and reuse the
    (n_ctx, 768) result across forward calls; the per-call forward is then a
    zero-copy broadcast.  `prompt_proj` may be stored in bf16 (recommended on
    v5e/v6e/v7x) — the kernel casts the tiny ctx to match and accumulates in
    fp32 on the MXU.
    """
    n_ctx, d_text = text_embeddings.shape
    d_text2, width = prompt_proj.shape
    assert d_text == d_text2

    bytes_accessed = (
        text_embeddings.size * text_embeddings.dtype.itemsize
        + prompt_proj.size * prompt_proj.dtype.itemsize
        + n_ctx * width * jnp.dtype(out_dtype).itemsize
    )
    cost = pl.CostEstimate(
        flops=2 * n_ctx * d_text * width,
        transcendentals=0,
        bytes_accessed=bytes_accessed,
    )

    return pl.pallas_call(
        _proj_kernel,
        out_shape=jax.ShapeDtypeStruct((n_ctx, width), out_dtype),
        # No grid: single invocation, full arrays resident in VMEM
        # (~1.5 MiB fp32 weight / ~0.75 MiB bf16 + tiny activations).
        in_specs=[
            pl.BlockSpec((n_ctx, d_text), lambda: (0, 0)),
            pl.BlockSpec((d_text, width), lambda: (0, 0)),
        ],
        out_specs=pl.BlockSpec((n_ctx, width), lambda: (0, 0)),
        cost_estimate=cost,
    )(text_embeddings, prompt_proj)


# ---------------------------------------------------------------------------
# Per-call forward wrappers (hot path — zero compute, zero copies)
# ---------------------------------------------------------------------------

def visual_udp_generator_coupled(x, projected_prompt):
    """not VL_independent: broadcast the precomputed (n_ctx, 768) to (B, n_ctx, 768).

    torch .expand(B, -1, -1) is a view; jnp.broadcast_to is likewise zero-copy
    under XLA.  All compute was hoisted to project_text_prompt().
    """
    B = x.shape[0]
    n_ctx, width = projected_prompt.shape
    return jnp.broadcast_to(projected_prompt[None], (B, n_ctx, width))


def visual_udp_generator_independent(x, prompt_embeddings):
    """VL_independent: prompt_embeddings.expand(B, -1, -1).

    Pure broadcast with zero compute — a Pallas kernel would only add launch
    overhead and B× HBM writes.
    """
    B = x.shape[0]
    _, num_tokens, width = prompt_embeddings.shape
    return jnp.broadcast_to(prompt_embeddings, (B, num_tokens, width))


# ---------------------------------------------------------------------------
# Pure-JAX references (correctness check)
# ---------------------------------------------------------------------------

def ref_coupled(x, text_embeddings, prompt_proj):
    B = x.shape[0]
    out = text_embeddings @ prompt_proj
    return jnp.broadcast_to(out[None], (B,) + out.shape)


def ref_independent(x, prompt_embeddings):
    B = x.shape[0]
    return jnp.broadcast_to(prompt_embeddings,
                            (B,) + prompt_embeddings.shape[1:])


# ---------------------------------------------------------------------------
# Main
# ---------------------------------------------------------------------------

if __name__ == "__main__":
    key = jax.random.PRNGKey(0)
    k_ctx, k_proj, k_emb, k_x = jax.random.split(key, 4)

    # Module-implied sizes: width=768, text dim=512; small batch / token counts.
    B = 2
    n_ctx = 8          # promptLearner.ctx length (small)
    num_tokens = 8     # config.vptNumTokens
    width = 768
    d_text = 512

    # Deterministic parameter init matching the torch scaling in __init__.
    scale = width ** (-0.5)
    scale_2 = d_text ** (-0.5)
    text_embeddings = jax.random.normal(k_ctx, (n_ctx, d_text), jnp.float32)
    prompt_proj = scale_2 * jax.random.normal(k_proj, (d_text, width), jnp.float32)
    prompt_embeddings = scale * jax.random.normal(
        k_emb, (1, num_tokens, width), jnp.float32)
    # NOTE: self.proj (768,768) is declared in __init__ but unused in forward.

    # Input image batch (NCHW) — only its batch dim is consumed.
    x = jax.random.normal(k_x, (B, 4, 16, 16), jnp.float32)

    # ---- param-load-time setup (runs once, NOT per forward call) ----------
    # fp32 weight path (exact torch semantics):
    projected_fp32 = jax.block_until_ready(
        project_text_prompt(text_embeddings, prompt_proj))
    # bf16-stored-weight path (recommended on v5e/v6e/v7x): the weight lives
    # in bf16 in the parameter state; cast happens here once, off the hot path.
    prompt_proj_bf16 = prompt_proj.astype(jnp.bfloat16)
    projected_bf16 = jax.block_until_ready(
        project_text_prompt(text_embeddings, prompt_proj_bf16))

    # ---- per-call forward: not VL_independent (fp32 exact) ----------------
    out_coupled = jax.block_until_ready(
        visual_udp_generator_coupled(x, projected_fp32))
    ref_c = ref_coupled(x, text_embeddings, prompt_proj)
    assert out_coupled.shape == (B, n_ctx, width)
    assert jnp.allclose(out_coupled, ref_c, atol=1e-4, rtol=1e-4)

    # ---- per-call forward: bf16-stored-weight variant ----------------------
    out_bf16 = jax.block_until_ready(
        visual_udp_generator_coupled(x, projected_bf16))
    assert out_bf16.shape == (B, n_ctx, width)
    assert jnp.allclose(out_bf16, ref_c, atol=2e-1, rtol=2e-2)

    # ---- per-call forward: VL_independent ----------------------------------
    out_indep = jax.block_until_ready(
        visual_udp_generator_independent(x, prompt_embeddings))
    ref_i = ref_independent(x, prompt_embeddings)
    assert out_indep.shape == (B, num_tokens, width)
    assert jnp.allclose(out_indep, ref_i, atol=1e-6, rtol=1e-6)

    print("KERNEL_OK")
</pallas_src>

<mosaic_0001>
module attributes {stable_mosaic.version = 11 : i64} {
  func.func @_proj_kernel(%arg0: memref<8x512xf32, #tpu.memory_space<vmem>>, %arg1: memref<512x768xf32, #tpu.memory_space<vmem>>, %arg2: memref<8x768xf32, #tpu.memory_space<vmem>>) attributes {dimension_semantics = [], scalar_prefetch = 0 : i64, scratch_operands = 0 : i64, tpu.core_type = #tpu.core_type<tc>} {
    %c0 = arith.constant 0 : index
    %c0_0 = arith.constant 0 : index
    %0 = vector.load %arg0[%c0, %c0_0] : memref<8x512xf32, #tpu.memory_space<vmem>>, vector<8x512xf32>
    %c0_1 = arith.constant 0 : index
    %c0_2 = arith.constant 0 : index
    %1 = vector.load %arg1[%c0_1, %c0_2] : memref<512x768xf32, #tpu.memory_space<vmem>>, vector<512x768xf32>
    %cst = arith.constant dense<0.000000e+00> : vector<8x768xf32>
    %2 = tpu.matmul %0, %1, %cst {dimension_numbers = #tpu.dot_dimension_numbers<[1], [0], [0], [1], [0, 0, 1, 1], [], []>} : vector<8x512xf32>, vector<512x768xf32>, vector<8x768xf32> -> vector<8x768xf32>
    %c0_3 = arith.constant 0 : index
    %c0_4 = arith.constant 0 : index
    %3 = vector.load %arg2[%c0_3, %c0_4] : memref<8x768xf32, #tpu.memory_space<vmem>>, vector<8x768xf32>
    tpu.vector_store %arg2[%c0_3, %c0_4], %2 {strides = array<i32>} : memref<8x768xf32, #tpu.memory_space<vmem>>, vector<8x768xf32>,
    return
  }
}

</mosaic_0001>

<bundles_post_ra>
// kernel: tpu_custom_call.1
= control target key start
LH: loop header
LB: loop body
LE: loop exit
PB: predicated region body
PF: predicated region fallthrough
CT: control target
= control target key end

     0   :  { %7 = vsyncpa [#allocation3], 0  ;;  %s1424_s0 = inlined_call_operand.hbm [shape: f32[8,512], index: 0, kind: input, shape index: {}]   ;;  %s1425_s1 = inlined_call_operand.hbm [shape: f32[512,768], index: 1, kind: input, shape index: {}]   ;;  %s1426_s2 = inlined_call_operand.hbm [shape: f32[8,768], index: 2, kind: output, shape index: {}]  }
   0x1   :  { %8 = vsyncpa [#allocation6], 0 }
   0x2   :  { %9 = vsyncpa [#allocation4], 0  ;;  %s1341_s9 = smov [#allocation2]   ;;  %s1342_s11 = smov [#allocation5]  }
   0x3   :  { %s16_s10 = sshll.u32 %s1341_s9, 4  ;;  %s25_s12 = sshll.u32 %s1342_s11, 4  ;;  %s17_s10 = int_to_ptr.vmem [resolvable:$true] %s16_s10  ;;  %s1361_s12 = int_to_ptr.vmem [resolvable:$true] %s25_s12 }
   0x4   :  { %s1269_s15 = scalar_lea.hbm %s1424_s0, 512 }
   0x5   :  { %p1270_p0 = scmp.ne.s32.totalorder %s1424_s0, %s1269_s15  ;;  %p1273_p1 = scmp.lt.u32.totalorder %s1269_s15, %s1424_s0 }
   0x7   :  { %p1275_p2 = pnand %p1273_p1, %p1270_p0 }
   0x9   :  { %1278 = shalt.err (!%p1275_p2)
}
   0xa   :  { %s1279_s20 = scalar_lea.vmem %s17_s10, 512  ;;  %p1284_p4 = scmp.lt.s32.totalorder %s17_s10, %s17_s10 }
   0xb   :  { %p1280_p3 = scmp.ne.s32.totalorder %s17_s10, %s1279_s20  ;;  %p1285_p5 = scmp.lt.s32.totalorder %s1279_s20, %s1279_s20 }
   0xd   :  { %p1286_p6 = por %p1285_p5, %p1284_p4 }
   0xf   :  { %p1287_p7 = pnand %p1286_p6, %p1280_p3 }
  0x11   :  { %1290 = shalt.err (!%p1287_p7)
}
  0x12   :  { %19 = dma.hbm_to_vmem [thread:$0]  %s1424_s0, 512, %s17_s10, [#allocation3]  }
  0x13   :  { %s1291_s25 = scalar_lea.hbm %s1425_s1, 49152 }
  0x14   :  { %p1292_p8 = scmp.ne.s32.totalorder %s1425_s1, %s1291_s25  ;;  %p1295_p9 = scmp.lt.u32.totalorder %s1291_s25, %s1425_s1 }
  0x16   :  { %p1297_p10 = pnand %p1295_p9, %p1292_p8 }
  0x18   :  { %1300 = shalt.err (!%p1297_p10)
}
  0x19   :  { %s1301_s30 = scalar_lea.vmem %s1361_s12, 49152  ;;  %p1306_p12 = scmp.lt.s32.totalorder %s1361_s12, %s1361_s12 }
  0x1a   :  { %p1302_p11 = scmp.ne.s32.totalorder %s1361_s12, %s1301_s30  ;;  %p1307_p13 = scmp.lt.s32.totalorder %s1301_s30, %s1301_s30 }
  0x1c   :  { %p1308_p0 = por %p1307_p13, %p1306_p12 }
  0x1e   :  { %p1309_p1 = pnand %p1308_p0, %p1302_p11 }
  0x20   :  { %1312 = shalt.err (!%p1309_p1)
}
  0x21   :  { %s1343_s0 = smov 768   ;;  %s1344_s3 = smov 48  }
  0x22   :  { %31 = dma.hbm_to_vmem [thread:$0]  %s1425_s1, 49152, %s1361_s12, [#allocation6], %s1343_s0, %s1343_s0, %s1344_s3  }
  0x23   :  { %1335 = dma.done.wait [#allocation3], 512  }
  0x24   :  { %1336 = vsyncadd [#allocation3], 4294966784 }
  0x25   :  { %1337 = dma.done.wait [#allocation6], 49152  }
  0x26   :  { %1338 = vsyncadd [#allocation6], 4294918144  ;;  %v43_v0 = vld [vmem:[#allocation5 + $0x8] sm:$0xff]  ;;  %v49_v1 = vld [vmem:[#allocation5 + $0x38] sm:$0xff]  ;;  %s1345_s1 = smov [#allocation7]  }
  0x27   :  { %v235_v2 = vld [vmem:[#allocation5 + $0x608] sm:$0xff]  ;;  %v874_v3 = vpack.c.bf16 %v49_v1, %v43_v0  ;;  %v241_v4 = vld [vmem:[#allocation5 + $0x638] sm:$0xff]  ;;  %v42_v5 = vld [vmem:[#allocation5] sm:$0xff]  ;;  %s864_s6 = sshll.u32 %s1345_s1, 4  ;;  %s865_s6 = int_to_ptr.vmem [resolvable:$true] %s864_s6 }
  0x28   :  { %v48_v6 = vld [vmem:[#allocation5 + $0x30] sm:$0xff]  ;;  %v938_v7 = vpack.c.bf16 %v241_v4, %v235_v2  ;;  %v234_v9 = vld [vmem:[#allocation5 + $0x600] sm:$0xff]  ;;  %v55_v11 = vld [vmem:[#allocation5 + $0x68] sm:$0xff]  ;;  %s1313_s7 = scalar_lea.vmem %s865_s6, 768  ;;  %p1318_p3 = scmp.lt.s32.totalorder %s865_s6, %s865_s6 }
  0x29   :  { %v876_v8 = vpack.c.bf16 %v48_v6, %v42_v5  ;;  %v240_v10 = vld [vmem:[#allocation5 + $0x630] sm:$0xff]  ;;  %875 = vmatprep.subr.bf16.mxu1 %v874_v3  ;;  %v61_v13 = vld [vmem:[#allocation5 + $0x98] sm:$0xff]  ;;  %v247_v14 = vld [vmem:[#allocation5 + $0x668] sm:$0xff]  ;;  %p1314_p2 = scmp.ne.s32.totalorder %s865_s6, %s1313_s7  ;;  %p1319_p4 = scmp.lt.s32.totalorder %s1313_s7, %s1313_s7 }
  0x2a   :  { %v940_v12 = vpack.c.bf16 %v240_v10, %v234_v9  ;;  %v253_v15 = vld [vmem:[#allocation5 + $0x698] sm:$0xff]  ;;  %939 = vmatprep.subr.bf16.mxu0 %v938_v7  ;;  %v878_v16 = vpack.c.bf16 %v61_v13, %v55_v11  ;;  %v54_v18 = vld [vmem:[#allocation5 + $0x60] sm:$0xff]  ;;  %v60_v19 = vld [vmem:[#allocation5 + $0x90] sm:$0xff] }
  0x2b   :  { %877 = vmatpush1.bf16.msra.mxu1 %v876_v8  ;;  %v942_v17 = vpack.c.bf16 %v253_v15, %v247_v14  ;;  %v246_v20 = vld [vmem:[#allocation5 + $0x660] sm:$0xff]  ;;  %v880_v21 = vpack.c.bf16 %v60_v19, %v54_v18  ;;  %v252_v22 = vld [vmem:[#allocation5 + $0x690] sm:$0xff]  ;;  %v67_v23 = vld [vmem:[#allocation5 + $0xc8] sm:$0xff]  ;;  %p1320_p5 = por %p1319_p4, %p1318_p3 }
  0x2c   :  { %941 = vmatpush1.bf16.msra.mxu0 %v940_v12  ;;  %v73_v24 = vld [vmem:[#allocation5 + $0xf8] sm:$0xff]  ;;  %879 = vmatprep.subr.bf16.mxu1 %v878_v16  ;;  %v944_v25 = vpack.c.bf16 %v252_v22, %v246_v20  ;;  %v259_v27 = vld [vmem:[#allocation5 + $0x6c8] sm:$0xff]  ;;  %v66_v29 = vld [vmem:[#allocation5 + $0xc0] sm:$0xff] }
  0x2d   :  { %943 = vmatprep.subr.bf16.mxu0 %v942_v17  ;;  %v882_v26 = vpack.c.bf16 %v73_v24, %v67_v23  ;;  %v265_v28 = vld [vmem:[#allocation5 + $0x6f8] sm:$0xff]  ;;  %v72_v31 = vld [vmem:[#allocation5 + $0xf0] sm:$0xff]  ;;  %v258_v32 = vld [vmem:[#allocation5 + $0x6c0] sm:$0xff]  ;;  %p1321_p6 = pnand %p1320_p5, %p1314_p2 }
  0x2e   :  { %v946_v30 = vpack.c.bf16 %v265_v28, %v259_v27  ;;  %v264_v33 = vld [vmem:[#allocation5 + $0x6f0] sm:$0xff]  ;;  %v884_v34 = vpack.c.bf16 %v72_v31, %v66_v29  ;;  %v79_v35 = vld [vmem:[#allocation5 + $0x128] sm:$0xff]  ;;  %v85_v36 = vld [vmem:[#allocation5 + $0x158] sm:$0xff] }
  0x2f   :  { %881 = vmatpush1.bf16.msra.mxu1 %v880_v21  ;;  %v271_v37 = vld [vmem:[#allocation5 + $0x728] sm:$0xff]  ;;  %v948_v38 = vpack.c.bf16 %v264_v33, %v258_v32  ;;  %v886_v39 = vpack.c.bf16 %v85_v36, %v79_v35  ;;  %v277_v40 = vld [vmem:[#allocation5 + $0x758] sm:$0xff]  ;;  %v78_v41 = vld [vmem:[#allocation5 + $0x120] sm:$0xff] }
  0x30   :  { %945 = vmatpush1.bf16.msra.mxu0 %v944_v25  ;;  %883 = vmatprep.subr.bf16.mxu1 %v882_v26  ;;  %v84_v42 = vld [vmem:[#allocation5 + $0x150] sm:$0xff]  ;;  %v950_v43 = vpack.c.bf16 %v277_v40, %v271_v37  ;;  %v270_v44 = vld [vmem:[#allocation5 + $0x720] sm:$0xff]  ;;  %v91_v46 = vld [vmem:[#allocation5 + $0x188] sm:$0xff] }
  0x31   :  { %947 = vmatprep.subr.bf16.mxu0 %v946_v30  ;;  %v276_v45 = vld [vmem:[#allocation5 + $0x750] sm:$0xff]  ;;  %v97_v47 = vld [vmem:[#allocation5 + $0x1b8] sm:$0xff]  ;;  %v283_v48 = vld [vmem:[#allocation5 + $0x788] sm:$0xff]  ;;  %v888_v50 = vpack.c.bf16 %v84_v42, %v78_v41 }
  0x32   :  { %v289_v49 = vld [vmem:[#allocation5 + $0x7b8] sm:$0xff]  ;;  %v952_v51 = vpack.c.bf16 %v276_v45, %v270_v44  ;;  %v890_v52 = vpack.c.bf16 %v97_v47, %v91_v46  ;;  %v90_v53 = vld [vmem:[#allocation5 + $0x180] sm:$0xff]  ;;  %v96_v54 = vld [vmem:[#allocation5 + $0x1b0] sm:$0xff] }
  0x33   :  { %885 = vmatpush1.bf16.msra.mxu1 %v884_v34  ;;  %v282_v55 = vld [vmem:[#allocation5 + $0x780] sm:$0xff]  ;;  %v954_v56 = vpack.c.bf16 %v289_v49, %v283_v48  ;;  %v288_v57 = vld [vmem:[#allocation5 + $0x7b0] sm:$0xff]  ;;  %v103_v58 = vld [vmem:[#allocation5 + $0x1e8] sm:$0xff]  ;;  %v892_v62 = vpack.c.bf16 %v96_v54, %v90_v53 }
  0x34   :  { %949 = vmatpush1.bf16.msra.mxu0 %v948_v38  ;;  %887 = vmatprep.subr.bf16.mxu1 %v886_v39  ;;  %v109_v59 = vld [vmem:[#allocation5 + $0x218] sm:$0xff]  ;;  %v295_v60 = vld [vmem:[#allocation5 + $0x7e8] sm:$0xff]  ;;  %v956_v63 = vpack.c.bf16 %v288_v57, %v282_v55  ;;  %v102_v1 = vld [vmem:[#allocation5 + $0x1e0] sm:$0xff] }
  0x35   :  { %951 = vmatprep.subr.bf16.mxu0 %v950_v43  ;;  %v301_v61 = vld [vmem:[#allocation5 + $0x818] sm:$0xff]  ;;  %v894_v0 = vpack.c.bf16 %v109_v59, %v103_v58  ;;  %v108_v2 = vld [vmem:[#allocation5 + $0x210] sm:$0xff]  ;;  %v294_v3 = vld [vmem:[#allocation5 + $0x7e0] sm:$0xff] }
  0x36   :  { %v958_v4 = vpack.c.bf16 %v301_v61, %v295_v60  ;;  %v300_v5 = vld [vmem:[#allocation5 + $0x810] sm:$0xff]  ;;  %v115_v6 = vld [vmem:[#allocation5 + $0x248] sm:$0xff]  ;;  %v121_v7 = vld [vmem:[#allocation5 + $0x278] sm:$0xff]  ;;  %v896_v10 = vpack.c.bf16 %v108_v2, %v102_v1 }
  0x37   :  { %889 = vmatpush1.bf16.msra.mxu1 %v888_v50  ;;  %v307_v8 = vld [vmem:[#allocation5 + $0x848] sm:$0xff]  ;;  %v313_v9 = vld [vmem:[#allocation5 + $0x878] sm:$0xff]  ;;  %v960_v11 = vpack.c.bf16 %v300_v5, %v294_v3  ;;  %v898_v12 = vpack.c.bf16 %v121_v7, %v115_v6  ;;  %v114_v13 = vld [vmem:[#allocation5 + $0x240] sm:$0xff] }
  0x38   :  { %953 = vmatpush1.bf16.msra.mxu0 %v952_v51  ;;  %891 = vmatprep.subr.bf16.mxu1 %v890_v52  ;;  %v120_v14 = vld [vmem:[#allocation5 + $0x270] sm:$0xff]  ;;  %v306_v15 = vld [vmem:[#allocation5 + $0x840] sm:$0xff]  ;;  %v962_v16 = vpack.c.bf16 %v313_v9, %v307_v8  ;;  %v127_v18 = vld [vmem:[#allocation5 + $0x2a8] sm:$0xff] }
  0x39   :  { %955 = vmatprep.subr.bf16.mxu0 %v954_v56  ;;  %v312_v17 = vld [vmem:[#allocation5 + $0x870] sm:$0xff]  ;;  %v133_v19 = vld [vmem:[#allocation5 + $0x2d8] sm:$0xff]  ;;  %v319_v20 = vld [vmem:[#allocation5 + $0x8a8] sm:$0xff]  ;;  %v900_v22 = vpack.c.bf16 %v120_v14, %v114_v13 }
  0x3a   :  { %v325_v21 = vld [vmem:[#allocation5 + $0x8d8] sm:$0xff]  ;;  %v964_v23 = vpack.c.bf16 %v312_v17, %v306_v15  ;;  %v902_v24 = vpack.c.bf16 %v133_v19, %v127_v18  ;;  %v126_v25 = vld [vmem:[#allocation5 + $0x2a0] sm:$0xff]  ;;  %v132_v26 = vld [vmem:[#allocation5 + $0x2d0] sm:$0xff] }
  0x3b   :  { %893 = vmatpush1.bf16.msra.mxu1 %v892_v62  ;;  %v318_v27 = vld [vmem:[#allocation5 + $0x8a0] sm:$0xff]  ;;  %v966_v28 = vpack.c.bf16 %v325_v21, %v319_v20  ;;  %v324_v29 = vld [vmem:[#allocation5 + $0x8d0] sm:$0xff]  ;;  %v139_v30 = vld [vmem:[#allocation5 + $0x308] sm:$0xff]  ;;  %v904_v34 = vpack.c.bf16 %v132_v26, %v126_v25 }
  0x3c   :  { %957 = vmatpush1.bf16.msra.mxu0 %v956_v63  ;;  %895 = vmatprep.subr.bf16.mxu1 %v894_v0  ;;  %v145_v31 = vld [vmem:[#allocation5 + $0x338] sm:$0xff]  ;;  %v331_v32 = vld [vmem:[#allocation5 + $0x908] sm:$0xff]  ;;  %v968_v35 = vpack.c.bf16 %v324_v29, %v318_v27  ;;  %v138_v37 = vld [vmem:[#allocation5 + $0x300] sm:$0xff] }
  0x3d   :  { %959 = vmatprep.subr.bf16.mxu0 %v958_v4  ;;  %v337_v33 = vld [vmem:[#allocation5 + $0x938] sm:$0xff]  ;;  %v906_v36 = vpack.c.bf16 %v145_v31, %v139_v30  ;;  %v144_v38 = vld [vmem:[#allocation5 + $0x330] sm:$0xff]  ;;  %v330_v39 = vld [vmem:[#allocation5 + $0x900] sm:$0xff] }
  0x3e   :  { %v970_v40 = vpack.c.bf16 %v337_v33, %v331_v32  ;;  %v336_v41 = vld [vmem:[#allocation5 + $0x930] sm:$0xff]  ;;  %v151_v42 = vld [vmem:[#allocation5 + $0x368] sm:$0xff]  ;;  %v157_v43 = vld [vmem:[#allocation5 + $0x398] sm:$0xff]  ;;  %v908_v46 = vpack.c.bf16 %v144_v38, %v138_v37 }
  0x3f   :  { %897 = vmatpush1.bf16.msra.mxu1 %v896_v10  ;;  %v343_v44 = vld [vmem:[#allocation5 + $0x968] sm:$0xff]  ;;  %v349_v45 = vld [vmem:[#allocation5 + $0x998] sm:$0xff]  ;;  %v972_v47 = vpack.c.bf16 %v336_v41, %v330_v39  ;;  %v910_v48 = vpack.c.bf16 %v157_v43, %v151_v42  ;;  %v150_v49 = vld [vmem:[#allocation5 + $0x360] sm:$0xff] }
  0x40   :  { %961 = vmatpush1.bf16.msra.mxu0 %v960_v11  ;;  %899 = vmatprep.subr.bf16.mxu1 %v898_v12  ;;  %v156_v50 = vld [vmem:[#allocation5 + $0x390] sm:$0xff]  ;;  %v342_v51 = vld [vmem:[#allocation5 + $0x960] sm:$0xff]  ;;  %v974_v52 = vpack.c.bf16 %v349_v45, %v343_v44  ;;  %v163_v54 = vld [vmem:[#allocation5 + $0x3c8] sm:$0xff] }
  0x41   :  { %963 = vmatprep.subr.bf16.mxu0 %v962_v16  ;;  %v348_v53 = vld [vmem:[#allocation5 + $0x990] sm:$0xff]  ;;  %v169_v55 = vld [vmem:[#allocation5 + $0x3f8] sm:$0xff]  ;;  %v355_v56 = vld [vmem:[#allocation5 + $0x9c8] sm:$0xff]  ;;  %v912_v58 = vpack.c.bf16 %v156_v50, %v150_v49 }
  0x42   :  { %v361_v57 = vld [vmem:[#allocation5 + $0x9f8] sm:$0xff]  ;;  %v976_v59 = vpack.c.bf16 %v348_v53, %v342_v51  ;;  %v914_v60 = vpack.c.bf16 %v169_v55, %v163_v54  ;;  %v162_v61 = vld [vmem:[#allocation5 + $0x3c0] sm:$0xff]  ;;  %v168_v62 = vld [vmem:[#allocation5 + $0x3f0] sm:$0xff] }
  0x43   :  { %901 = vmatpush1.bf16.msra.mxu1 %v900_v22  ;;  %v354_v63 = vld [vmem:[#allocation5 + $0x9c0] sm:$0xff]  ;;  %v978_v0 = vpack.c.bf16 %v361_v57, %v355_v56  ;;  %v360_v1 = vld [vmem:[#allocation5 + $0x9f0] sm:$0xff]  ;;  %v175_v2 = vld [vmem:[#allocation5 + $0x428] sm:$0xff]  ;;  %v916_v6 = vpack.c.bf16 %v168_v62, %v162_v61 }
  0x44   :  { %965 = vmatpush1.bf16.msra.mxu0 %v964_v23  ;;  %903 = vmatprep.subr.bf16.mxu1 %v902_v24  ;;  %v181_v3 = vld [vmem:[#allocation5 + $0x458] sm:$0xff]  ;;  %v367_v4 = vld [vmem:[#allocation5 + $0xa28] sm:$0xff]  ;;  %v174_v7 = vld [vmem:[#allocation5 + $0x420] sm:$0xff]  ;;  %v980_v8 = vpack.c.bf16 %v360_v1, %v354_v63 }
  0x45   :  { %967 = vmatprep.subr.bf16.mxu0 %v966_v28  ;;  %v373_v5 = vld [vmem:[#allocation5 + $0xa58] sm:$0xff]  ;;  %v918_v9 = vpack.c.bf16 %v181_v3, %v175_v2  ;;  %v180_v10 = vld [vmem:[#allocation5 + $0x450] sm:$0xff]  ;;  %v366_v11 = vld [vmem:[#allocation5 + $0xa20] sm:$0xff] }
  0x46   :  { %v372_v12 = vld [vmem:[#allocation5 + $0xa50] sm:$0xff]  ;;  %v982_v13 = vpack.c.bf16 %v373_v5, %v367_v4  ;;  %v187_v14 = vld [vmem:[#allocation5 + $0x488] sm:$0xff]  ;;  %v193_v15 = vld [vmem:[#allocation5 + $0x4b8] sm:$0xff]  ;;  %v920_v20 = vpack.c.bf16 %v180_v10, %v174_v7 }
  0x47   :  { %905 = vmatpush1.bf16.msra.mxu1 %v904_v34  ;;  %v1392_v16 = vld [vmem:[#allocation2 + $0x8] sm:$0xff]  ;;  %v385_v18 = vld [vmem:[#allocation5 + $0xab8] sm:$0xff]  ;;  %v984_v21 = vpack.c.bf16 %v372_v12, %v366_v11  ;;  %v922_v22 = vpack.c.bf16 %v193_v15, %v187_v14  ;;  %v186_v23 = vld [vmem:[#allocation5 + $0x480] sm:$0xff] }
  0x48   :  { %969 = vmatpush1.bf16.msra.mxu0 %v968_v35  ;;  %907 = vmatprep.subr.bf16.mxu1 %v906_v36  ;;  %v379_v17 = vld [vmem:[#allocation5 + $0xa88] sm:$0xff]  ;;  %v1395_v19 = vld [vmem:[#allocation2 + $0x18] sm:$0xff]  ;;  %v192_v24 = vld [vmem:[#allocation5 + $0x4b0] sm:$0xff] }
  0x49   :  { %971 = vmatprep.subr.bf16.mxu0 %v970_v40  ;;  %490 = vmatprep.mubr.f32.mxu1 %v1392_v16  ;;  %v378_v25 = vld [vmem:[#allocation5 + $0xa80] sm:$0xff]  ;;  %v986_v26 = vpack.c.bf16 %v385_v18, %v379_v17  ;;  %v384_v27 = vld [vmem:[#allocation5 + $0xab0] sm:$0xff]  ;;  %v199_v28 = vld [vmem:[#allocation5 + $0x4e8] sm:$0xff]  ;;  %v924_v32 = vpack.c.bf16 %v192_v24, %v186_v23 }
  0x4a   :  { %561 = vmatprep.mubr.f32.mxu0 %v1395_v19  ;;  %v205_v29 = vld [vmem:[#allocation5 + $0x518] sm:$0xff]  ;;  %v391_v30 = vld [vmem:[#allocation5 + $0xae8] sm:$0xff]  ;;  %v988_v33 = vpack.c.bf16 %v384_v27, %v378_v25  ;;  %v198_v35 = vld [vmem:[#allocation5 + $0x4e0] sm:$0xff] }
  0x4b   :  { %909 = vmatpush1.bf16.msra.mxu1 %v908_v46  ;;  %v397_v31 = vld [vmem:[#allocation5 + $0xb18] sm:$0xff]  ;;  %v926_v34 = vpack.c.bf16 %v205_v29, %v199_v28  ;;  %v204_v36 = vld [vmem:[#allocation5 + $0x510] sm:$0xff]  ;;  %v390_v37 = vld [vmem:[#allocation5 + $0xae0] sm:$0xff] }
  0x4c   :  { %973 = vmatpush1.bf16.msra.mxu0 %v972_v47  ;;  %911 = vmatprep.subr.bf16.mxu1 %v910_v48  ;;  %v990_v38 = vpack.c.bf16 %v397_v31, %v391_v30  ;;  %v396_v39 = vld [vmem:[#allocation5 + $0xb10] sm:$0xff]  ;;  %v211_v40 = vld [vmem:[#allocation5 + $0x548] sm:$0xff]  ;;  %v217_v41 = vld [vmem:[#allocation5 + $0x578] sm:$0xff]  ;;  %v928_v44 = vpack.c.bf16 %v204_v36, %v198_v35 }
  0x4d   :  { %975 = vmatprep.subr.bf16.mxu0 %v974_v52  ;;  %v403_v42 = vld [vmem:[#allocation5 + $0xb48] sm:$0xff]  ;;  %v409_v43 = vld [vmem:[#allocation5 + $0xb78] sm:$0xff]  ;;  %v992_v45 = vpack.c.bf16 %v396_v39, %v390_v37  ;;  %v930_v46 = vpack.c.bf16 %v217_v41, %v211_v40  ;;  %v210_v47 = vld [vmem:[#allocation5 + $0x540] sm:$0xff] }
  0x4e   :  { %v216_v48 = vld [vmem:[#allocation5 + $0x570] sm:$0xff]  ;;  %v402_v49 = vld [vmem:[#allocation5 + $0xb40] sm:$0xff]  ;;  %v994_v50 = vpack.c.bf16 %v409_v43, %v403_v42  ;;  %v223_v52 = vld [vmem:[#allocation5 + $0x5a8] sm:$0xff] }
  0x4f   :  { %913 = vmatpush1.bf16.msra.mxu1 %v912_v58  ;;  %v408_v51 = vld [vmem:[#allocation5 + $0xb70] sm:$0xff]  ;;  %v229_v53 = vld [vmem:[#allocation5 + $0x5d8] sm:$0xff]  ;;  %v415_v54 = vld [vmem:[#allocation5 + $0xba8] sm:$0xff]  ;;  %v932_v56 = vpack.c.bf16 %v216_v48, %v210_v47 }
  0x50   :  { %977 = vmatpush1.bf16.msra.mxu0 %v976_v59  ;;  %915 = vmatprep.subr.bf16.mxu1 %v914_v60  ;;  %v421_v55 = vld [vmem:[#allocation5 + $0xbd8] sm:$0xff]  ;;  %v996_v57 = vpack.c.bf16 %v408_v51, %v402_v49  ;;  %v934_v58 = vpack.c.bf16 %v229_v53, %v223_v52  ;;  %v222_v59 = vld [vmem:[#allocation5 + $0x5a0] sm:$0xff]  ;;  %v228_v60 = vld [vmem:[#allocation5 + $0x5d0] sm:$0xff] }
  0x51   :  { %979 = vmatprep.subr.bf16.mxu0 %v978_v0  ;;  %v414_v61 = vld [vmem:[#allocation5 + $0xba0] sm:$0xff]  ;;  %v998_v62 = vpack.c.bf16 %v421_v55, %v415_v54  ;;  %v420_v63 = vld [vmem:[#allocation5 + $0xbd0] sm:$0xff]  ;;  %v45_v0 = vld [vmem:[#allocation5 + $0x18] sm:$0xff]  ;;  %v936_v4 = vpack.c.bf16 %v228_v60, %v222_v59 }
  0x52   :  { %v51_v1 = vld [vmem:[#allocation5 + $0x48] sm:$0xff]  ;;  %v53_v3 = vld [vmem:[#allocation5 + $0x58] sm:$0xff]  ;;  %v1000_v5 = vpack.c.bf16 %v420_v63, %v414_v61  ;;  %v44_v7 = vld [vmem:[#allocation5 + $0x10] sm:$0xff] }
  0x53   :  { %917 = vmatpush1.bf16.msra.mxu1 %v916_v6  ;;  %v47_v2 = vld [vmem:[#allocation5 + $0x28] sm:$0xff]  ;;  %v1002_v6 = vpack.c.bf16 %v51_v1, %v45_v0  ;;  %v52_v11 = vld [vmem:[#allocation5 + $0x50] sm:$0xff]  ;;  %v57_v12 = vld [vmem:[#allocation5 + $0x78] sm:$0xff] }
  0x54   :  { %981 = vmatpush1.bf16.msra.mxu0 %v980_v8  ;;  %919 = vmatprep.subr.bf16.mxu1 %v918_v9  ;;  %v50_v8 = vld [vmem:[#allocation5 + $0x40] sm:$0xff]  ;;  %v1130_v10 = vpack.c.bf16 %v53_v3, %v47_v2  ;;  %v59_v14 = vld [vmem:[#allocation5 + $0x88] sm:$0xff]  ;;  %v65_v15 = vld [vmem:[#allocation5 + $0xb8] sm:$0xff] }
  0x55   :  { %983 = vmatprep.subr.bf16.mxu0 %v982_v13  ;;  %v46_v9 = vld [vmem:[#allocation5 + $0x20] sm:$0xff]  ;;  %v63_v13 = vld [vmem:[#allocation5 + $0xa8] sm:$0xff]  ;;  %v1400_v18 = vld [vmem:[#allocation2 + $0x10] sm:$0xff] }
  0x56   :  { %v1398_v17 = vld [vmem:[#allocation2] sm:$0xff]  ;;  %v56_v23 = vld [vmem:[#allocation5 + $0x70] sm:$0xff]  ;;  %v69_v28 = vld [vmem:[#allocation5 + $0xd8] sm:$0xff] }
  0x57   :  { %921 = vmatpush1.bf16.msra.mxu1 %v920_v20  ;;  %v1004_v20 = vpack.c.bf16 %v50_v8, %v44_v7  ;;  %v62_v24 = vld [vmem:[#allocation5 + $0xa0] sm:$0xff]  ;;  %v64_v27 = vld [vmem:[#allocation5 + $0xb0] sm:$0xff]  ;;  %v75_v29 = vld [vmem:[#allocation5 + $0x108] sm:$0xff] }
  0x58   :  { %985 = vmatpush1.bf16.msra.mxu0 %v984_v21  ;;  %923 = vmatprep.subr.bf16.mxu1 %v922_v22  ;;  %v1132_v21 = vpack.c.bf16 %v52_v11, %v46_v9  ;;  %v1006_v22 = vpack.c.bf16 %v63_v13, %v57_v12  ;;  %v58_v25 = vld [vmem:[#allocation5 + $0x80] sm:$0xff]  ;;  %v71_v30 = vld [vmem:[#allocation5 + $0xe8] sm:$0xff]  ;;  %v77_v31 = vld [vmem:[#allocation5 + $0x118] sm:$0xff] }
  0x59   :  { %987 = vmatprep.subr.bf16.mxu0 %v986_v26  ;;  %v1134_v26 = vpack.c.bf16 %v65_v15, %v59_v14  ;;  %v68_v35 = vld [vmem:[#allocation5 + $0xd0] sm:$0xff]  ;;  %v74_v36 = vld [vmem:[#allocation5 + $0x100] sm:$0xff]  ;;  %v81_v40 = vld [vmem:[#allocation5 + $0x138] sm:$0xff] }
  0x5a   :  { %v70_v37 = vld [vmem:[#allocation5 + $0xe0] sm:$0xff]  ;;  %v76_v39 = vld [vmem:[#allocation5 + $0x110] sm:$0xff]  ;;  %v87_v41 = vld [vmem:[#allocation5 + $0x168] sm:$0xff] }
  0x5b   :  { %925 = vmatpush1.bf16.msra.mxu1 %v924_v32  ;;  %v1008_v32 = vpack.c.bf16 %v62_v24, %v56_v23  ;;  %v83_v42 = vld [vmem:[#allocation5 + $0x148] sm:$0xff]  ;;  %v89_v43 = vld [vmem:[#allocation5 + $0x178] sm:$0xff]  ;;  %v80_v47 = vld [vmem:[#allocation5 + $0x130] sm:$0xff] }
  0x5c   :  { %989 = vmatpush1.bf16.msra.mxu0 %v988_v33  ;;  %927 = vmatprep.subr.bf16.mxu1 %v926_v34  ;;  %v1136_v33 = vpack.c.bf16 %v64_v27, %v58_v25  ;;  %v1010_v34 = vpack.c.bf16 %v75_v29, %v69_v28  ;;  %v86_v48 = vld [vmem:[#allocation5 + $0x160] sm:$0xff]  ;;  %v88_v51 = vld [vmem:[#allocation5 + $0x170] sm:$0xff]  ;;  %v93_v52 = vld [vmem:[#allocation5 + $0x198] sm:$0xff] }
  0x5d   :  { %991 = vmatprep.subr.bf16.mxu0 %v990_v38  ;;  %v1138_v38 = vpack.c.bf16 %v77_v31, %v71_v30  ;;  %v82_v49 = vld [vmem:[#allocation5 + $0x140] sm:$0xff]  ;;  %v99_v53 = vld [vmem:[#allocation5 + $0x1c8] sm:$0xff]  ;;  %v101_v55 = vld [vmem:[#allocation5 + $0x1d8] sm:$0xff] }
  0x5e   :  { %v95_v54 = vld [vmem:[#allocation5 + $0x1a8] sm:$0xff]  ;;  %v98_v59 = vld [vmem:[#allocation5 + $0x1c0] sm:$0xff]  ;;  %v105_v63 = vld [vmem:[#allocation5 + $0x1f8] sm:$0xff] }
  0x5f   :  { %929 = vmatpush1.bf16.msra.mxu1 %v928_v44  ;;  %v1012_v44 = vpack.c.bf16 %v74_v36, %v68_v35  ;;  %v94_v60 = vld [vmem:[#allocation5 + $0x1a0] sm:$0xff]  ;;  %v1146_v61 = vpack.c.bf16 %v101_v55, %v95_v54  ;;  %v111_v0 = vld [vmem:[#allocation5 + $0x228] sm:$0xff]  ;;  %v113_v2 = vld [vmem:[#allocation5 + $0x238] sm:$0xff] }
  0x60   :  { %993 = vmatpush1.bf16.msra.mxu0 %v992_v45  ;;  %931 = vmatprep.subr.bf16.mxu1 %v930_v46  ;;  %v1140_v45 = vpack.c.bf16 %v76_v39, %v70_v37  ;;  %v1014_v46 = vpack.c.bf16 %v87_v41, %v81_v40  ;;  %v107_v1 = vld [vmem:[#allocation5 + $0x208] sm:$0xff]  ;;  %v110_v7 = vld [vmem:[#allocation5 + $0x220] sm:$0xff]  ;;  %v117_v11 = vld [vmem:[#allocation5 + $0x258] sm:$0xff] }
  0x61   :  { %995 = vmatprep.subr.bf16.mxu0 %v994_v50  ;;  %v1142_v50 = vpack.c.bf16 %v89_v43, %v83_v42  ;;  %v106_v8 = vld [vmem:[#allocation5 + $0x200] sm:$0xff]  ;;  %v1150_v9 = vpack.c.bf16 %v113_v2, %v107_v1  ;;  %v123_v12 = vld [vmem:[#allocation5 + $0x288] sm:$0xff]  ;;  %v125_v14 = vld [vmem:[#allocation5 + $0x298] sm:$0xff] }
  0x62   :  { %v119_v13 = vld [vmem:[#allocation5 + $0x268] sm:$0xff]  ;;  %v122_v23 = vld [vmem:[#allocation5 + $0x280] sm:$0xff]  ;;  %v129_v27 = vld [vmem:[#allocation5 + $0x2b8] sm:$0xff] }
  0x63   :  { %933 = vmatpush1.bf16.msra.mxu1 %v932_v56  ;;  %v1016_v56 = vpack.c.bf16 %v86_v48, %v80_v47  ;;  %v118_v24 = vld [vmem:[#allocation5 + $0x260] sm:$0xff]  ;;  %v1154_v25 = vpack.c.bf16 %v125_v14, %v119_v13  ;;  %v135_v28 = vld [vmem:[#allocation5 + $0x2e8] sm:$0xff]  ;;  %v137_v30 = vld [vmem:[#allocation5 + $0x2f8] sm:$0xff] }
  0x64   :  { %997 = vmatpush1.bf16.msra.mxu0 %v996_v57  ;;  %935 = vmatprep.subr.bf16.mxu1 %v934_v58  ;;  %v1018_v57 = vpack.c.bf16 %v99_v53, %v93_v52  ;;  %v92_v58 = vld [vmem:[#allocation5 + $0x190] sm:$0xff]  ;;  %v131_v29 = vld [vmem:[#allocation5 + $0x2c8] sm:$0xff]  ;;  %v134_v35 = vld [vmem:[#allocation5 + $0x2e0] sm:$0xff] }
  0x65   :  { %999 = vmatprep.subr.bf16.mxu0 %v998_v62  ;;  %v100_v62 = vld [vmem:[#allocation5 + $0x1d0] sm:$0xff]  ;;  %v1020_v3 = vpack.c.bf16 %v98_v59, %v92_v58  ;;  %v130_v36 = vld [vmem:[#allocation5 + $0x2c0] sm:$0xff]  ;;  %v1158_v37 = vpack.c.bf16 %v137_v30, %v131_v29  ;;  %v141_v39 = vld [vmem:[#allocation5 + $0x318] sm:$0xff] }
  0x66   :  { %v147_v40 = vld [vmem:[#allocation5 + $0x348] sm:$0xff]  ;;  %v149_v42 = vld [vmem:[#allocation5 + $0x358] sm:$0xff]  ;;  %v146_v47 = vld [vmem:[#allocation5 + $0x340] sm:$0xff] }
  0x67   :  { %937 = vmatpush1.bf16.msra.mxu1 %v936_v4  ;;  %v1148_v4 = vpack.c.bf16 %v100_v62, %v94_v60  ;;  %v143_v41 = vld [vmem:[#allocation5 + $0x328] sm:$0xff]  ;;  %v142_v48 = vld [vmem:[#allocation5 + $0x320] sm:$0xff]  ;;  %v161_v54 = vld [vmem:[#allocation5 + $0x3b8] sm:$0xff] }
  0x68   :  { %1001 = vmatpush1.bf16.msra.mxu0 %v1000_v5  ;;  %1003 = vmatprep.subr.bf16.mxu1 %v1002_v6  ;;  %v1022_v5 = vpack.c.bf16 %v111_v0, %v105_v63  ;;  %v104_v6 = vld [vmem:[#allocation5 + $0x1f0] sm:$0xff]  ;;  %v159_v52 = vld [vmem:[#allocation5 + $0x3a8] sm:$0xff]  ;;  %v158_v58 = vld [vmem:[#allocation5 + $0x3a0] sm:$0xff] }
  0x69   :  { %1131 = vmatprep.subr.bf16.mxu0 %v1130_v10  ;;  %v112_v10 = vld [vmem:[#allocation5 + $0x230] sm:$0xff]  ;;  %v1024_v15 = vpack.c.bf16 %v110_v7, %v104_v6  ;;  %v155_v53 = vld [vmem:[#allocation5 + $0x388] sm:$0xff]  ;;  %v154_v59 = vld [vmem:[#allocation5 + $0x380] sm:$0xff] }
  0x6a   :  { %491 = vmatmul.mubr.f32.vlgmr.msra.gmra.mrb[0].mxu1 %v1398_v17  ;;  %v1166_v60 = vpack.c.bf16 %v161_v54, %v155_v53  ;;  %v165_v62 = vld [vmem:[#allocation5 + $0x3d8] sm:$0xff]  ;;  %v171_v63 = vld [vmem:[#allocation5 + $0x408] sm:$0xff]  ;;  %v170_v6 = vld [vmem:[#allocation5 + $0x400] sm:$0xff] }
  0x6b   :  { %562 = vmatmul.mubr.f32.vlgmr.msra.gmra.mrb[0].mxu0 %v1400_v18  ;;  %1005 = vmatpush1.bf16.msra.mxu1 %v1004_v20  ;;  %v1152_v20 = vpack.c.bf16 %v112_v10, %v106_v8  ;;  %v167_v0 = vld [vmem:[#allocation5 + $0x3e8] sm:$0xff]  ;;  %v173_v1 = vld [vmem:[#allocation5 + $0x418] sm:$0xff]  ;;  %v166_v7 = vld [vmem:[#allocation5 + $0x3e0] sm:$0xff] }
  0x6c   :  { %1133 = vmatpush1.bf16.msra.mxu0 %v1132_v21  ;;  %1007 = vmatprep.subr.bf16.mxu1 %v1006_v22  ;;  %v1026_v21 = vpack.c.bf16 %v123_v12, %v117_v11  ;;  %v116_v22 = vld [vmem:[#allocation5 + $0x250] sm:$0xff]  ;;  %v1170_v8 = vpack.c.bf16 %v173_v1, %v167_v0  ;;  %v177_v10 = vld [vmem:[#allocation5 + $0x438] sm:$0xff]  ;;  %v183_v11 = vld [vmem:[#allocation5 + $0x468] sm:$0xff] }
  0x6d   :  { %1135 = vmatprep.subr.bf16.mxu0 %v1134_v26  ;;  %632 = vmatprep.mubr.f32.mxu1 %v1392_v16  ;;  %v124_v26 = vld [vmem:[#allocation5 + $0x290] sm:$0xff]  ;;  %v1028_v31 = vpack.c.bf16 %v122_v23, %v116_v22  ;;  %v179_v12 = vld [vmem:[#allocation5 + $0x448] sm:$0xff]  ;;  %v185_v13 = vld [vmem:[#allocation5 + $0x478] sm:$0xff] }
  0x6e   :  { %774 = vmatprep.mubr.f32.mxu0 %v1392_v16  ;;  %v1144_v16 = vpack.c.bf16 %v88_v51, %v82_v49  ;;  %v1162_v49 = vpack.c.bf16 %v149_v42, %v143_v41  ;;  %v153_v51 = vld [vmem:[#allocation5 + $0x378] sm:$0xff]  ;;  %v182_v22 = vld [vmem:[#allocation5 + $0x460] sm:$0xff] }
  0x6f   :  { %1009 = vmatpush1.bf16.msra.mxu1 %v1008_v32  ;;  %v1156_v32 = vpack.c.bf16 %v124_v26, %v118_v24  ;;  %v178_v23 = vld [vmem:[#allocation5 + $0x440] sm:$0xff]  ;;  %v1174_v24 = vpack.c.bf16 %v185_v13, %v179_v12  ;;  %v189_v26 = vld [vmem:[#allocation5 + $0x498] sm:$0xff] }
  0x70   :  { %1137 = vmatpush1.bf16.msra.mxu0 %v1136_v33  ;;  %1011 = vmatprep.subr.bf16.mxu1 %v1010_v34  ;;  %v1030_v33 = vpack.c.bf16 %v135_v28, %v129_v27  ;;  %v128_v34 = vld [vmem:[#allocation5 + $0x2b0] sm:$0xff]  ;;  %v195_v27 = vld [vmem:[#allocation5 + $0x4c8] sm:$0xff]  ;;  %v197_v29 = vld [vmem:[#allocation5 + $0x4d8] sm:$0xff] }
  0x71   :  { %1139 = vmatprep.subr.bf16.mxu0 %v1138_v38  ;;  %v136_v38 = vld [vmem:[#allocation5 + $0x2f0] sm:$0xff]  ;;  %v1032_v43 = vpack.c.bf16 %v134_v35, %v128_v34  ;;  %v191_v28 = vld [vmem:[#allocation5 + $0x4a8] sm:$0xff]  ;;  %v194_v34 = vld [vmem:[#allocation5 + $0x4c0] sm:$0xff] }
  0x72   :  { %v190_v35 = vld [vmem:[#allocation5 + $0x4a0] sm:$0xff]  ;;  %v209_v41 = vld [vmem:[#allocation5 + $0x538] sm:$0xff] }
  0x73   :  { %1013 = vmatpush1.bf16.msra.mxu1 %v1012_v44  ;;  %v1160_v44 = vpack.c.bf16 %v136_v38, %v130_v36  ;;  %v1178_v36 = vpack.c.bf16 %v197_v29, %v191_v28  ;;  %v201_v38 = vld [vmem:[#allocation5 + $0x4f8] sm:$0xff] }
  0x74   :  { %1141 = vmatpush1.bf16.msra.mxu0 %v1140_v45  ;;  %1015 = vmatprep.subr.bf16.mxu1 %v1014_v46  ;;  %v1034_v45 = vpack.c.bf16 %v147_v40, %v141_v39  ;;  %v140_v46 = vld [vmem:[#allocation5 + $0x310] sm:$0xff]  ;;  %v207_v39 = vld [vmem:[#allocation5 + $0x528] sm:$0xff]  ;;  %v221_v53 = vld [vmem:[#allocation5 + $0x598] sm:$0xff] }
  0x75   :  { %1143 = vmatprep.subr.bf16.mxu0 %v1142_v50  ;;  %v148_v50 = vld [vmem:[#allocation5 + $0x350] sm:$0xff]  ;;  %v1036_v55 = vpack.c.bf16 %v146_v47, %v140_v46  ;;  %v203_v40 = vld [vmem:[#allocation5 + $0x508] sm:$0xff]  ;;  %v206_v46 = vld [vmem:[#allocation5 + $0x520] sm:$0xff] }
  0x76   :  { %v202_v47 = vld [vmem:[#allocation5 + $0x500] sm:$0xff]  ;;  %v233_v0 = vld [vmem:[#allocation5 + $0x5f8] sm:$0xff] }
  0x77   :  { %1017 = vmatpush1.bf16.msra.mxu1 %v1016_v56  ;;  %v1164_v56 = vpack.c.bf16 %v148_v50, %v142_v48  ;;  %v1182_v48 = vpack.c.bf16 %v209_v41, %v203_v40  ;;  %v213_v50 = vld [vmem:[#allocation5 + $0x558] sm:$0xff] }
  0x78   :  { %1145 = vmatpush1.bf16.msra.mxu0 %v1144_v16  ;;  %1019 = vmatprep.subr.bf16.mxu1 %v1018_v57  ;;  %v1038_v16 = vpack.c.bf16 %v159_v52, %v153_v51  ;;  %v152_v57 = vld [vmem:[#allocation5 + $0x370] sm:$0xff]  ;;  %v219_v51 = vld [vmem:[#allocation5 + $0x588] sm:$0xff]  ;;  %v245_v12 = vld [vmem:[#allocation5 + $0x658] sm:$0xff] }
  0x79   :  { %1147 = vmatprep.subr.bf16.mxu0 %v1146_v61  ;;  %v160_v61 = vld [vmem:[#allocation5 + $0x3b0] sm:$0xff]  ;;  %v1040_v2 = vpack.c.bf16 %v158_v58, %v152_v57  ;;  %v215_v52 = vld [vmem:[#allocation5 + $0x568] sm:$0xff]  ;;  %v218_v57 = vld [vmem:[#allocation5 + $0x580] sm:$0xff] }
  0x7a   :  { %v214_v58 = vld [vmem:[#allocation5 + $0x560] sm:$0xff]  ;;  %v257_v28 = vld [vmem:[#allocation5 + $0x6b8] sm:$0xff] }
  0x7b   :  { %1021 = vmatpush1.bf16.msra.mxu1 %v1020_v3  ;;  %v1168_v3 = vpack.c.bf16 %v160_v61, %v154_v59  ;;  %v1186_v59 = vpack.c.bf16 %v221_v53, %v215_v52  ;;  %v225_v61 = vld [vmem:[#allocation5 + $0x5b8] sm:$0xff] }
  0x7c   :  { %1149 = vmatpush1.bf16.msra.mxu0 %v1148_v4  ;;  %1023 = vmatprep.subr.bf16.mxu1 %v1022_v5  ;;  %v1042_v4 = vpack.c.bf16 %v171_v63, %v165_v62  ;;  %v164_v5 = vld [vmem:[#allocation5 + $0x3d0] sm:$0xff]  ;;  %v231_v62 = vld [vmem:[#allocation5 + $0x5e8] sm:$0xff]  ;;  %v269_v40 = vld [vmem:[#allocation5 + $0x718] sm:$0xff] }
  0x7d   :  { %1151 = vmatprep.subr.bf16.mxu0 %v1150_v9  ;;  %v172_v9 = vld [vmem:[#allocation5 + $0x410] sm:$0xff]  ;;  %v1044_v14 = vpack.c.bf16 %v170_v6, %v164_v5  ;;  %v227_v63 = vld [vmem:[#allocation5 + $0x5c8] sm:$0xff]  ;;  %v230_v5 = vld [vmem:[#allocation5 + $0x5e0] sm:$0xff] }
  0x7e   :  { %v226_v6 = vld [vmem:[#allocation5 + $0x5c0] sm:$0xff]  ;;  %v281_v52 = vld [vmem:[#allocation5 + $0x778] sm:$0xff] }
  0x7f   :  { %1025 = vmatpush1.bf16.msra.mxu1 %v1024_v15  ;;  %v1172_v15 = vpack.c.bf16 %v172_v9, %v166_v7  ;;  %v1190_v7 = vpack.c.bf16 %v233_v0, %v227_v63  ;;  %v237_v9 = vld [vmem:[#allocation5 + $0x618] sm:$0xff] }
  0x80   :  { %1153 = vmatpush1.bf16.msra.mxu0 %v1152_v20  ;;  %1027 = vmatprep.subr.bf16.mxu1 %v1026_v21  ;;  %v1046_v20 = vpack.c.bf16 %v183_v11, %v177_v10  ;;  %v176_v21 = vld [vmem:[#allocation5 + $0x430] sm:$0xff]  ;;  %v243_v10 = vld [vmem:[#allocation5 + $0x648] sm:$0xff] }
  0x81   :  { %1155 = vmatprep.subr.bf16.mxu0 %v1154_v25  ;;  %v184_v25 = vld [vmem:[#allocation5 + $0x470] sm:$0xff]  ;;  %v1048_v30 = vpack.c.bf16 %v182_v22, %v176_v21  ;;  %v239_v11 = vld [vmem:[#allocation5 + $0x628] sm:$0xff]  ;;  %v242_v21 = vld [vmem:[#allocation5 + $0x640] sm:$0xff] }
  0x82   :  { %v238_v22 = vld [vmem:[#allocation5 + $0x620] sm:$0xff] }
  0x83   :  { %1029 = vmatpush1.bf16.msra.mxu1 %v1028_v31  ;;  %v1176_v31 = vpack.c.bf16 %v184_v25, %v178_v23  ;;  %v1194_v23 = vpack.c.bf16 %v245_v12, %v239_v11  ;;  %v249_v25 = vld [vmem:[#allocation5 + $0x678] sm:$0xff] }
  0x84   :  { %1157 = vmatpush1.bf16.msra.mxu0 %v1156_v32  ;;  %1031 = vmatprep.subr.bf16.mxu1 %v1030_v33  ;;  %v1050_v32 = vpack.c.bf16 %v195_v27, %v189_v26  ;;  %v188_v33 = vld [vmem:[#allocation5 + $0x490] sm:$0xff]  ;;  %v255_v26 = vld [vmem:[#allocation5 + $0x6a8] sm:$0xff] }
  0x85   :  { %1159 = vmatprep.subr.bf16.mxu0 %v1158_v37  ;;  %v196_v37 = vld [vmem:[#allocation5 + $0x4d0] sm:$0xff]  ;;  %v1052_v42 = vpack.c.bf16 %v194_v34, %v188_v33  ;;  %v251_v27 = vld [vmem:[#allocation5 + $0x688] sm:$0xff]  ;;  %v254_v33 = vld [vmem:[#allocation5 + $0x6a0] sm:$0xff] }
  0x86   :  { %v250_v34 = vld [vmem:[#allocation5 + $0x680] sm:$0xff] }
  0x87   :  { %1033 = vmatpush1.bf16.msra.mxu1 %v1032_v43  ;;  %v1180_v43 = vpack.c.bf16 %v196_v37, %v190_v35  ;;  %v1198_v35 = vpack.c.bf16 %v257_v28, %v251_v27  ;;  %v261_v37 = vld [vmem:[#allocation5 + $0x6d8] sm:$0xff] }
  0x88   :  { %1161 = vmatpush1.bf16.msra.mxu0 %v1160_v44  ;;  %1035 = vmatprep.subr.bf16.mxu1 %v1034_v45  ;;  %v1054_v44 = vpack.c.bf16 %v207_v39, %v201_v38  ;;  %v200_v45 = vld [vmem:[#allocation5 + $0x4f0] sm:$0xff]  ;;  %v267_v38 = vld [vmem:[#allocation5 + $0x708] sm:$0xff] }
  0x89   :  { %1163 = vmatprep.subr.bf16.mxu0 %v1162_v49  ;;  %v208_v49 = vld [vmem:[#allocation5 + $0x530] sm:$0xff]  ;;  %v1056_v54 = vpack.c.bf16 %v206_v46, %v200_v45  ;;  %v263_v39 = vld [vmem:[#allocation5 + $0x6e8] sm:$0xff]  ;;  %v266_v45 = vld [vmem:[#allocation5 + $0x700] sm:$0xff] }
  0x8a   :  { %v262_v46 = vld [vmem:[#allocation5 + $0x6e0] sm:$0xff] }
  0x8b   :  { %1037 = vmatpush1.bf16.msra.mxu1 %v1036_v55  ;;  %v1184_v55 = vpack.c.bf16 %v208_v49, %v202_v47  ;;  %v1202_v47 = vpack.c.bf16 %v269_v40, %v263_v39  ;;  %v273_v49 = vld [vmem:[#allocation5 + $0x738] sm:$0xff] }
  0x8c   :  { %1165 = vmatpush1.bf16.msra.mxu0 %v1164_v56  ;;  %1039 = vmatprep.subr.bf16.mxu1 %v1038_v16  ;;  %v1058_v56 = vpack.c.bf16 %v219_v51, %v213_v50  ;;  %v212_v16 = vld [vmem:[#allocation5 + $0x550] sm:$0xff]  ;;  %v279_v50 = vld [vmem:[#allocation5 + $0x768] sm:$0xff] }
  0x8d   :  { %1167 = vmatprep.subr.bf16.mxu0 %v1166_v60  ;;  %v220_v60 = vld [vmem:[#allocation5 + $0x590] sm:$0xff]  ;;  %v1060_v1 = vpack.c.bf16 %v218_v57, %v212_v16  ;;  %v275_v51 = vld [vmem:[#allocation5 + $0x748] sm:$0xff]  ;;  %v274_v16 = vld [vmem:[#allocation5 + $0x740] sm:$0xff] }
  0x8e   :  { %v1206_v57 = vpack.c.bf16 %v281_v52, %v275_v51 }
  0x8f   :  { %1041 = vmatpush1.bf16.msra.mxu1 %v1040_v2  ;;  %v1188_v2 = vpack.c.bf16 %v220_v60, %v214_v58  ;;  %v280_v58 = vld [vmem:[#allocation5 + $0x770] sm:$0xff]  ;;  %v291_v60 = vld [vmem:[#allocation5 + $0x7c8] sm:$0xff] }
  0x90   :  { %1169 = vmatpush1.bf16.msra.mxu0 %v1168_v3  ;;  %1043 = vmatprep.subr.bf16.mxu1 %v1042_v4  ;;  %v1062_v3 = vpack.c.bf16 %v231_v62, %v225_v61  ;;  %v224_v4 = vld [vmem:[#allocation5 + $0x5b0] sm:$0xff]  ;;  %v287_v61 = vld [vmem:[#allocation5 + $0x7a8] sm:$0xff]  ;;  %v293_v62 = vld [vmem:[#allocation5 + $0x7d8] sm:$0xff] }
  0x91   :  { %1171 = vmatprep.subr.bf16.mxu0 %v1170_v8  ;;  %v232_v8 = vld [vmem:[#allocation5 + $0x5f0] sm:$0xff]  ;;  %v1064_v13 = vpack.c.bf16 %v230_v5, %v224_v4  ;;  %v1210_v4 = vpack.c.bf16 %v293_v62, %v287_v61 }
  0x92   :  { %v292_v5 = vld [vmem:[#allocation5 + $0x7d0] sm:$0xff] }
  0x93   :  { %1045 = vmatpush1.bf16.msra.mxu1 %v1044_v14  ;;  %v1192_v14 = vpack.c.bf16 %v232_v8, %v226_v6  ;;  %v297_v6 = vld [vmem:[#allocation5 + $0x7f8] sm:$0xff]  ;;  %v299_v8 = vld [vmem:[#allocation5 + $0x808] sm:$0xff] }
  0x94   :  { %1173 = vmatpush1.bf16.msra.mxu0 %v1172_v15  ;;  %1047 = vmatprep.subr.bf16.mxu1 %v1046_v20  ;;  %v1066_v15 = vpack.c.bf16 %v243_v10, %v237_v9  ;;  %v236_v20 = vld [vmem:[#allocation5 + $0x610] sm:$0xff]  ;;  %v305_v9 = vld [vmem:[#allocation5 + $0x838] sm:$0xff] }
  0x95   :  { %1175 = vmatprep.subr.bf16.mxu0 %v1174_v24  ;;  %v244_v24 = vld [vmem:[#allocation5 + $0x650] sm:$0xff]  ;;  %v1068_v29 = vpack.c.bf16 %v242_v21, %v236_v20  ;;  %v1214_v20 = vpack.c.bf16 %v305_v9, %v299_v8 }
  0x96   :  { %v304_v21 = vld [vmem:[#allocation5 + $0x830] sm:$0xff] }
  0x97   :  { %1049 = vmatpush1.bf16.msra.mxu1 %v1048_v30  ;;  %v1196_v30 = vpack.c.bf16 %v244_v24, %v238_v22  ;;  %v309_v22 = vld [vmem:[#allocation5 + $0x858] sm:$0xff]  ;;  %v311_v24 = vld [vmem:[#allocation5 + $0x868] sm:$0xff] }
  0x98   :  { %1177 = vmatpush1.bf16.msra.mxu0 %v1176_v31  ;;  %1051 = vmatprep.subr.bf16.mxu1 %v1050_v32  ;;  %v1070_v31 = vpack.c.bf16 %v255_v26, %v249_v25  ;;  %v248_v32 = vld [vmem:[#allocation5 + $0x670] sm:$0xff]  ;;  %v317_v25 = vld [vmem:[#allocation5 + $0x898] sm:$0xff] }
  0x99   :  { %1179 = vmatprep.subr.bf16.mxu0 %v1178_v36  ;;  %v256_v36 = vld [vmem:[#allocation5 + $0x6b0] sm:$0xff]  ;;  %v1072_v41 = vpack.c.bf16 %v254_v33, %v248_v32  ;;  %v1218_v32 = vpack.c.bf16 %v317_v25, %v311_v24 }
  0x9a   :  { %v316_v33 = vld [vmem:[#allocation5 + $0x890] sm:$0xff] }
  0x9b   :  { %1053 = vmatpush1.bf16.msra.mxu1 %v1052_v42  ;;  %v1200_v42 = vpack.c.bf16 %v256_v36, %v250_v34  ;;  %v321_v34 = vld [vmem:[#allocation5 + $0x8b8] sm:$0xff]  ;;  %v323_v36 = vld [vmem:[#allocation5 + $0x8c8] sm:$0xff] }
  0x9c   :  { %1181 = vmatpush1.bf16.msra.mxu0 %v1180_v43  ;;  %1055 = vmatprep.subr.bf16.mxu1 %v1054_v44  ;;  %v1074_v43 = vpack.c.bf16 %v267_v38, %v261_v37  ;;  %v260_v44 = vld [vmem:[#allocation5 + $0x6d0] sm:$0xff]  ;;  %v329_v37 = vld [vmem:[#allocation5 + $0x8f8] sm:$0xff] }
  0x9d   :  { %1183 = vmatprep.subr.bf16.mxu0 %v1182_v48  ;;  %v268_v48 = vld [vmem:[#allocation5 + $0x710] sm:$0xff] }
  0x9e   :  { %v1204_v53 = vpack.c.bf16 %v268_v48, %v262_v46  ;;  %v333_v46 = vld [vmem:[#allocation5 + $0x918] sm:$0xff]  ;;  %v335_v48 = vld [vmem:[#allocation5 + $0x928] sm:$0xff] }
  0x9f   :  { %1057 = vmatpush1.bf16.msra.mxu1 %v1056_v54  ;;  %v1078_v54 = vpack.c.bf16 %v279_v50, %v273_v49  ;;  %v341_v49 = vld [vmem:[#allocation5 + $0x958] sm:$0xff] }
  0xa0   :  { %1185 = vmatpush1.bf16.msra.mxu0 %v1184_v55  ;;  %1059 = vmatprep.subr.bf16.mxu1 %v1058_v56  ;;  %v272_v55 = vld [vmem:[#allocation5 + $0x730] sm:$0xff]  ;;  %v278_v56 = vld [vmem:[#allocation5 + $0x760] sm:$0xff] }
  0xa1   :  { %1187 = vmatprep.subr.bf16.mxu0 %v1186_v59  ;;  %v285_v59 = vld [vmem:[#allocation5 + $0x798] sm:$0xff]  ;;  %v1080_v63 = vpack.c.bf16 %v278_v56, %v272_v55  ;;  %v1226_v55 = vpack.c.bf16 %v341_v49, %v335_v48  ;;  %v340_v56 = vld [vmem:[#allocation5 + $0x950] sm:$0xff] }
  0xa2   :  { %v1082_v0 = vpack.c.bf16 %v291_v60, %v285_v59  ;;  %v353_v59 = vld [vmem:[#allocation5 + $0x9b8] sm:$0xff] }
  0xa3   :  { %1061 = vmatpush1.bf16.msra.mxu1 %v1060_v1  ;;  %v284_v1 = vld [vmem:[#allocation5 + $0x790] sm:$0xff] }
  0xa4   :  { %1189 = vmatpush1.bf16.msra.mxu0 %v1188_v2  ;;  %1063 = vmatprep.subr.bf16.mxu1 %v1062_v3  ;;  %v290_v2 = vld [vmem:[#allocation5 + $0x7c0] sm:$0xff] }
  0xa5   :  { %1191 = vmatprep.subr.bf16.mxu0 %v1190_v7  ;;  %v286_v3 = vld [vmem:[#allocation5 + $0x7a0] sm:$0xff]  ;;  %v303_v7 = vld [vmem:[#allocation5 + $0x828] sm:$0xff]  ;;  %v1084_v10 = vpack.c.bf16 %v290_v2, %v284_v1  ;;  %v352_v2 = vld [vmem:[#allocation5 + $0x9b0] sm:$0xff] }
  0xa6   :  { %v1212_v11 = vpack.c.bf16 %v292_v5, %v286_v3  ;;  %v1086_v12 = vpack.c.bf16 %v303_v7, %v297_v6  ;;  %v357_v3 = vld [vmem:[#allocation5 + $0x9d8] sm:$0xff]  ;;  %v359_v5 = vld [vmem:[#allocation5 + $0x9e8] sm:$0xff] }
  0xa7   :  { %1065 = vmatpush1.bf16.msra.mxu1 %v1064_v13  ;;  %v296_v13 = vld [vmem:[#allocation5 + $0x7f0] sm:$0xff]  ;;  %v365_v6 = vld [vmem:[#allocation5 + $0xa18] sm:$0xff] }
  0xa8   :  { %1193 = vmatpush1.bf16.msra.mxu0 %v1192_v14  ;;  %1067 = vmatprep.subr.bf16.mxu1 %v1066_v15  ;;  %v302_v14 = vld [vmem:[#allocation5 + $0x820] sm:$0xff] }
  0xa9   :  { %1195 = vmatprep.subr.bf16.mxu0 %v1194_v23  ;;  %v298_v15 = vld [vmem:[#allocation5 + $0x800] sm:$0xff]  ;;  %v315_v23 = vld [vmem:[#allocation5 + $0x888] sm:$0xff]  ;;  %v1088_v26 = vpack.c.bf16 %v302_v14, %v296_v13  ;;  %v1234_v13 = vpack.c.bf16 %v365_v6, %v359_v5  ;;  %v364_v14 = vld [vmem:[#allocation5 + $0xa10] sm:$0xff] }
  0xaa   :  { %633 = vmatmul.mubr.f32.vlgmr.msra.gmra.mrb[2].mxu1 %v1398_v17  ;;  %v1216_v27 = vpack.c.bf16 %v304_v21, %v298_v15  ;;  %v1090_v28 = vpack.c.bf16 %v315_v23, %v309_v22  ;;  %v369_v15 = vld [vmem:[#allocation5 + $0xa38] sm:$0xff]  ;;  %v371_v21 = vld [vmem:[#allocation5 + $0xa48] sm:$0xff] }
  0xab   :  { %1069 = vmatpush1.bf16.msra.mxu1 %v1068_v29  ;;  %775 = vmatmul.mubr.f32.vlgmr.msra.gmra.mrb[2].mxu0 %v1398_v17  ;;  %v1076_v17 = vpack.c.bf16 %v266_v45, %v260_v44  ;;  %v308_v29 = vld [vmem:[#allocation5 + $0x850] sm:$0xff]  ;;  %v1222_v44 = vpack.c.bf16 %v329_v37, %v323_v36  ;;  %v377_v22 = vld [vmem:[#allocation5 + $0xa78] sm:$0xff] }
  0xac   :  { %1197 = vmatpush1.bf16.msra.mxu0 %v1196_v30  ;;  %1071 = vmatprep.subr.bf16.mxu1 %v1070_v31  ;;  %v314_v30 = vld [vmem:[#allocation5 + $0x880] sm:$0xff]  ;;  %v328_v45 = vld [vmem:[#allocation5 + $0x8f0] sm:$0xff] }
  0xad   :  { %1199 = vmatprep.subr.bf16.mxu0 %v1198_v35  ;;  %703 = vmatprep.mubr.f32.mxu1 %v1395_v19  ;;  %v310_v31 = vld [vmem:[#allocation5 + $0x860] sm:$0xff]  ;;  %v327_v35 = vld [vmem:[#allocation5 + $0x8e8] sm:$0xff]  ;;  %v1092_v38 = vpack.c.bf16 %v314_v30, %v308_v29  ;;  %v1238_v29 = vpack.c.bf16 %v377_v22, %v371_v21  ;;  %v376_v30 = vld [vmem:[#allocation5 + $0xa70] sm:$0xff] }
  0xae   :  { %845 = vmatprep.mubr.f32.mxu0 %v1395_v19  ;;  %v1208_v19 = vpack.c.bf16 %v280_v58, %v274_v16  ;;  %v1220_v39 = vpack.c.bf16 %v316_v33, %v310_v31  ;;  %v1094_v40 = vpack.c.bf16 %v327_v35, %v321_v34  ;;  %v345_v16 = vld [vmem:[#allocation5 + $0x978] sm:$0xff]  ;;  %v347_v58 = vld [vmem:[#allocation5 + $0x988] sm:$0xff] }
  0xaf   :  { %1073 = vmatpush1.bf16.msra.mxu1 %v1072_v41  ;;  %v320_v41 = vld [vmem:[#allocation5 + $0x8b0] sm:$0xff]  ;;  %v1230_v1 = vpack.c.bf16 %v353_v59, %v347_v58  ;;  %v381_v31 = vld [vmem:[#allocation5 + $0xa98] sm:$0xff]  ;;  %v383_v33 = vld [vmem:[#allocation5 + $0xaa8] sm:$0xff] }
  0xb0   :  { %1201 = vmatpush1.bf16.msra.mxu0 %v1200_v42  ;;  %1075 = vmatprep.subr.bf16.mxu1 %v1074_v43  ;;  %v326_v42 = vld [vmem:[#allocation5 + $0x8e0] sm:$0xff]  ;;  %v389_v34 = vld [vmem:[#allocation5 + $0xad8] sm:$0xff] }
  0xb1   :  { %1203 = vmatprep.subr.bf16.mxu0 %v1202_v47  ;;  %v322_v43 = vld [vmem:[#allocation5 + $0x8c0] sm:$0xff]  ;;  %v339_v47 = vld [vmem:[#allocation5 + $0x948] sm:$0xff]  ;;  %v1096_v50 = vpack.c.bf16 %v326_v42, %v320_v41  ;;  %v1242_v41 = vpack.c.bf16 %v389_v34, %v383_v33  ;;  %v388_v42 = vld [vmem:[#allocation5 + $0xad0] sm:$0xff] }
  0xb2   :  { %v1224_v51 = vpack.c.bf16 %v328_v45, %v322_v43  ;;  %v1098_v52 = vpack.c.bf16 %v339_v47, %v333_v46  ;;  %v393_v43 = vld [vmem:[#allocation5 + $0xaf8] sm:$0xff]  ;;  %v395_v45 = vld [vmem:[#allocation5 + $0xb08] sm:$0xff] }
  0xb3   :  { %1077 = vmatpush1.bf16.msra.mxu1 %v1076_v17  ;;  %v332_v17 = vld [vmem:[#allocation5 + $0x910] sm:$0xff]  ;;  %v401_v46 = vld [vmem:[#allocation5 + $0xb38] sm:$0xff] }
  0xb4   :  { %1205 = vmatpush1.bf16.msra.mxu0 %v1204_v53  ;;  %1079 = vmatprep.subr.bf16.mxu1 %v1078_v54  ;;  %v338_v53 = vld [vmem:[#allocation5 + $0x940] sm:$0xff] }
  0xb5   :  { %1207 = vmatprep.subr.bf16.mxu0 %v1206_v57  ;;  %v334_v54 = vld [vmem:[#allocation5 + $0x920] sm:$0xff]  ;;  %v351_v57 = vld [vmem:[#allocation5 + $0x9a8] sm:$0xff]  ;;  %v1100_v60 = vpack.c.bf16 %v338_v53, %v332_v17  ;;  %v1246_v17 = vpack.c.bf16 %v401_v46, %v395_v45  ;;  %v400_v53 = vld [vmem:[#allocation5 + $0xb30] sm:$0xff] }
  0xb6   :  { %v1228_v61 = vpack.c.bf16 %v340_v56, %v334_v54  ;;  %v1102_v62 = vpack.c.bf16 %v351_v57, %v345_v16  ;;  %v405_v54 = vld [vmem:[#allocation5 + $0xb58] sm:$0xff]  ;;  %v407_v56 = vld [vmem:[#allocation5 + $0xb68] sm:$0xff] }
  0xb7   :  { %1081 = vmatpush1.bf16.msra.mxu1 %v1080_v63  ;;  %v344_v63 = vld [vmem:[#allocation5 + $0x970] sm:$0xff]  ;;  %v413_v16 = vld [vmem:[#allocation5 + $0xb98] sm:$0xff] }
  0xb8   :  { %1209 = vmatpush1.bf16.msra.mxu0 %v1208_v19  ;;  %1083 = vmatprep.subr.bf16.mxu1 %v1082_v0  ;;  %v350_v19 = vld [vmem:[#allocation5 + $0x9a0] sm:$0xff] }
  0xb9   :  { %1211 = vmatprep.subr.bf16.mxu0 %v1210_v4  ;;  %v346_v0 = vld [vmem:[#allocation5 + $0x980] sm:$0xff]  ;;  %v363_v4 = vld [vmem:[#allocation5 + $0xa08] sm:$0xff]  ;;  %v1104_v7 = vpack.c.bf16 %v350_v19, %v344_v63  ;;  %v1250_v63 = vpack.c.bf16 %v413_v16, %v407_v56  ;;  %v412_v19 = vld [vmem:[#allocation5 + $0xb90] sm:$0xff] }
  0xba   :  { %v1232_v8 = vpack.c.bf16 %v352_v2, %v346_v0  ;;  %v1106_v9 = vpack.c.bf16 %v363_v4, %v357_v3  ;;  %v417_v0 = vld [vmem:[#allocation5 + $0xbb8] sm:$0xff]  ;;  %v419_v2 = vld [vmem:[#allocation5 + $0xbc8] sm:$0xff] }
  0xbb   :  { %1085 = vmatpush1.bf16.msra.mxu1 %v1084_v10  ;;  %v356_v10 = vld [vmem:[#allocation5 + $0x9d0] sm:$0xff]  ;;  %v425_v3 = vld [vmem:[#allocation5 + $0xbf8] sm:$0xff] }
  0xbc   :  { %1213 = vmatpush1.bf16.msra.mxu0 %v1212_v11  ;;  %1087 = vmatprep.subr.bf16.mxu1 %v1086_v12  ;;  %v362_v11 = vld [vmem:[#allocation5 + $0xa00] sm:$0xff] }
  0xbd   :  { %1215 = vmatprep.subr.bf16.mxu0 %v1214_v20  ;;  %v358_v12 = vld [vmem:[#allocation5 + $0x9e0] sm:$0xff]  ;;  %v375_v20 = vld [vmem:[#allocation5 + $0xa68] sm:$0xff]  ;;  %v1108_v23 = vpack.c.bf16 %v362_v11, %v356_v10  ;;  %v424_v11 = vld [vmem:[#allocation5 + $0xbf0] sm:$0xff] }
  0xbe   :  { %v1236_v24 = vpack.c.bf16 %v364_v14, %v358_v12  ;;  %v1110_v25 = vpack.c.bf16 %v375_v20, %v369_v15  ;;  %v418_v10 = vld [vmem:[#allocation5 + $0xbc0] sm:$0xff] }
  0xbf   :  { %1089 = vmatpush1.bf16.msra.mxu1 %v1088_v26  ;;  %v368_v26 = vld [vmem:[#allocation5 + $0xa30] sm:$0xff] }
  0xc0   :  { %1217 = vmatpush1.bf16.msra.mxu0 %v1216_v27  ;;  %1091 = vmatprep.subr.bf16.mxu1 %v1090_v28  ;;  %v374_v27 = vld [vmem:[#allocation5 + $0xa60] sm:$0xff] }
  0xc1   :  { %1219 = vmatprep.subr.bf16.mxu0 %v1218_v32  ;;  %v370_v28 = vld [vmem:[#allocation5 + $0xa40] sm:$0xff]  ;;  %v387_v32 = vld [vmem:[#allocation5 + $0xac8] sm:$0xff]  ;;  %v1112_v35 = vpack.c.bf16 %v374_v27, %v368_v26 }
  0xc2   :  { %v1240_v36 = vpack.c.bf16 %v376_v30, %v370_v28  ;;  %v1114_v37 = vpack.c.bf16 %v387_v32, %v381_v31 }
  0xc3   :  { %1093 = vmatpush1.bf16.msra.mxu1 %v1092_v38  ;;  %v380_v38 = vld [vmem:[#allocation5 + $0xa90] sm:$0xff] }
  0xc4   :  { %1221 = vmatpush1.bf16.msra.mxu0 %v1220_v39  ;;  %1095 = vmatprep.subr.bf16.mxu1 %v1094_v40  ;;  %v386_v39 = vld [vmem:[#allocation5 + $0xac0] sm:$0xff] }
  0xc5   :  { %1223 = vmatprep.subr.bf16.mxu0 %v1222_v44  ;;  %v382_v40 = vld [vmem:[#allocation5 + $0xaa0] sm:$0xff]  ;;  %v399_v44 = vld [vmem:[#allocation5 + $0xb28] sm:$0xff]  ;;  %v1116_v47 = vpack.c.bf16 %v386_v39, %v380_v38 }
  0xc6   :  { %v1244_v48 = vpack.c.bf16 %v388_v42, %v382_v40  ;;  %v1118_v49 = vpack.c.bf16 %v399_v44, %v393_v43 }
  0xc7   :  { %1097 = vmatpush1.bf16.msra.mxu1 %v1096_v50  ;;  %v392_v50 = vld [vmem:[#allocation5 + $0xaf0] sm:$0xff] }
  0xc8   :  { %1225 = vmatpush1.bf16.msra.mxu0 %v1224_v51  ;;  %1099 = vmatprep.subr.bf16.mxu1 %v1098_v52  ;;  %v398_v51 = vld [vmem:[#allocation5 + $0xb20] sm:$0xff] }
  0xc9   :  { %1227 = vmatprep.subr.bf16.mxu0 %v1226_v55  ;;  %v394_v52 = vld [vmem:[#allocation5 + $0xb00] sm:$0xff]  ;;  %v411_v55 = vld [vmem:[#allocation5 + $0xb88] sm:$0xff]  ;;  %v1120_v57 = vpack.c.bf16 %v398_v51, %v392_v50 }
  0xca   :  { %v1248_v58 = vpack.c.bf16 %v400_v53, %v394_v52  ;;  %v1122_v59 = vpack.c.bf16 %v411_v55, %v405_v54 }
  0xcb   :  { %1101 = vmatpush1.bf16.msra.mxu1 %v1100_v60  ;;  %v404_v60 = vld [vmem:[#allocation5 + $0xb50] sm:$0xff] }
  0xcc   :  { %1229 = vmatpush1.bf16.msra.mxu0 %v1228_v61  ;;  %1103 = vmatprep.subr.bf16.mxu1 %v1102_v62  ;;  %v410_v61 = vld [vmem:[#allocation5 + $0xb80] sm:$0xff] }
  0xcd   :  { %1231 = vmatprep.subr.bf16.mxu0 %v1230_v1  ;;  %v406_v62 = vld [vmem:[#allocation5 + $0xb60] sm:$0xff]  ;;  %v423_v1 = vld [vmem:[#allocation5 + $0xbe8] sm:$0xff]  ;;  %v1124_v4 = vpack.c.bf16 %v410_v61, %v404_v60 }
  0xce   :  { %v1252_v5 = vpack.c.bf16 %v412_v19, %v406_v62  ;;  %v1126_v6 = vpack.c.bf16 %v423_v1, %v417_v0 }
  0xcf   :  { %1105 = vmatpush1.bf16.msra.mxu1 %v1104_v7  ;;  %v416_v7 = vld [vmem:[#allocation5 + $0xbb0] sm:$0xff] }
  0xd0   :  { %1233 = vmatpush1.bf16.msra.mxu0 %v1232_v8  ;;  %1107 = vmatprep.subr.bf16.mxu1 %v1106_v9  ;;  %v422_v8 = vld [vmem:[#allocation5 + $0xbe0] sm:$0xff]  ;;  %v1254_v9 = vpack.c.bf16 %v425_v3, %v419_v2 }
  0xd1   :  { %1235 = vmatprep.subr.bf16.mxu0 %v1234_v13  ;;  %v1128_v12 = vpack.c.bf16 %v422_v8, %v416_v7  ;;  %v1256_v13 = vpack.c.bf16 %v424_v11, %v418_v10 }
  0xd3   :  { %1109 = vmatpush1.bf16.msra.mxu1 %v1108_v23 }
  0xd4   :  { %1237 = vmatpush1.bf16.msra.mxu0 %v1236_v24  ;;  %1111 = vmatprep.subr.bf16.mxu1 %v1110_v25 }
  0xd5   :  { %1239 = vmatprep.subr.bf16.mxu0 %v1238_v29 }
  0xd7   :  { %1113 = vmatpush1.bf16.msra.mxu1 %v1112_v35 }
  0xd8   :  { %1241 = vmatpush1.bf16.msra.mxu0 %v1240_v36  ;;  %1115 = vmatprep.subr.bf16.mxu1 %v1114_v37 }
  0xd9   :  { %1243 = vmatprep.subr.bf16.mxu0 %v1242_v41 }
  0xdb   :  { %1117 = vmatpush1.bf16.msra.mxu1 %v1116_v47 }
  0xdc   :  { %1245 = vmatpush1.bf16.msra.mxu0 %v1244_v48  ;;  %1119 = vmatprep.subr.bf16.mxu1 %v1118_v49 }
  0xdd   :  { %1247 = vmatprep.subr.bf16.mxu0 %v1246_v17 }
  0xdf   :  { %1121 = vmatpush1.bf16.msra.mxu1 %v1120_v57 }
  0xe0   :  { %1249 = vmatpush1.bf16.msra.mxu0 %v1248_v58  ;;  %1123 = vmatprep.subr.bf16.mxu1 %v1122_v59 }
  0xe1   :  { %1251 = vmatprep.subr.bf16.mxu0 %v1250_v63 }
  0xe3   :  { %1125 = vmatpush1.bf16.msra.mxu1 %v1124_v4 }
  0xe4   :  { %1253 = vmatpush1.bf16.msra.mxu0 %v1252_v5  ;;  %1127 = vmatprep.subr.bf16.mxu1 %v1126_v6 }
  0xe5   :  { %1255 = vmatprep.subr.bf16.mxu0 %v1254_v9 }
  0xe7   :  { %1129 = vmatpush1.bf16.msra.mxu1 %v1128_v12 }
  0xe8   :  { %1257 = vmatpush1.bf16.msra.mxu0 %v1256_v13 }
  0xea   :  { %704 = vmatmul.mubr.f32.vlgmr.msra.gmra.mrb[2].mxu1 %v1400_v18 }
  0xeb   :  { %846 = vmatmul.mubr.f32.vlgmr.msra.gmra.mrb[2].mxu0 %v1400_v18 }
 0x13d   :  { %v492_v14 = vpop.f32.mrb[0].mxu1 }
 0x13e   :  { %v563_v15 = vpop.f32.mrb[0].mxu0  ;;  %v494_v20 = vpop.f32.mrb[1].mxu1 }
 0x13f   :  { %v564_v21 = vadd.f32 %v563_v15, %v492_v14  ;;  %v565_v22 = vpop.f32.mrb[1].mxu0 }
 0x140   :  { %v566_v23 = vadd.f32 %v565_v22, %v494_v20 }
 0x141   :  { %852 = vst [vmem:[#allocation7] sm:$0xff] %v564_v21 }
 0x142   :  { %853 = vst [vmem:[#allocation7 + $0x8] sm:$0xff] %v566_v23 }
 0x1bd   :  { %v705_v24 = vpop.f32.mrb[2].mxu1 }
 0x1be   :  { %854 = vst [vmem:[#allocation7 + $0x10] sm:$0xff] %v705_v24  ;;  %v847_v25 = vpop.f32.mrb[2].mxu0  ;;  %v707_v26 = vpop.f32.mrb[3].mxu1 }
 0x1bf   :  { %856 = vst [vmem:[#allocation7 + $0x20] sm:$0xff] %v847_v25  ;;  %855 = vst [vmem:[#allocation7 + $0x18] sm:$0xff] %v707_v26  ;;  %v849_v27 = vpop.f32.mrb[3].mxu0 }
 0x1c0   :  { %857 = vst [vmem:[#allocation7 + $0x28] sm:$0xff] %v849_v27 }
 0x1c1   :  { %1324 = shalt.err (!%p1321_p6)
}
 0x1c2   :  { %s1325_s10 = scalar_lea.hbm %s1426_s2, 768 }
 0x1c3   :  { %p1326_p7 = scmp.ne.s32.totalorder %s1426_s2, %s1325_s10  ;;  %p1329_p8 = scmp.lt.u32.totalorder %s1325_s10, %s1426_s2 }
 0x1c5   :  { %p1331_p9 = pnand %p1329_p8, %p1326_p7 }
 0x1c7   :  { %1334 = shalt.err (!%p1331_p9)
}
 0x1c8   :  { %867 = dma.vmem_to_hbm [thread:$0]  %s865_s6, 768, %s1426_s2, [#allocation4]  }
 0x1c9   :  { %1339 = dma.done.wait [#allocation4], 768  }
 0x1ca   :  { %1340 = vsyncadd [#allocation4], 4294966528 }
 0x1cb   :  { %871 = vsyncpa [#allocation3], 1 }
 0x1cc   :  { %872 = vsyncpa [#allocation6], 1 }
 0x1cd   :  { %873 = vsyncpa [#allocation4], 1 }

</bundles_post_ra>
